<compile_context>
chip_gen: v7x
topology: tpu7x:2x2x1
jax: 0.10.0
libtpu: 0.0.40
codegen_flags: <defaults>
</compile_context>

<pallas_src>
import jax
import jax.numpy as jnp
from jax.experimental import pallas as pl
from jax.experimental.pallas import tpu as pltpu


def _sigmoid_mul_kernel(gate_ref, x_ref, o_ref):
    # gate_ref: (tr, 1) ; x_ref, o_ref: (tr, HW)
    g = jax.nn.sigmoid(gate_ref[...].astype(jnp.float32))   # (tr, 1), f32
    o_ref[...] = (g * x_ref[...]).astype(o_ref.dtype)       # broadcast over lanes


@jax.jit
def sigmoid_mul(x_gate_nchw, x_nchw):
    """x_gate_nchw: (N, C, 1, 1), x_nchw: (N, C, H, W) -> (N, C, H, W)."""
    N, C, H, W = x_nchw.shape
    assert x_gate_nchw.shape == (N, C, 1, 1)

    rows = N * C
    hw = H * W

    # Free, contiguous views (no data movement): channels on the sublane axis,
    # spatial on the lane axis; gate is a per-row column.
    x_rc = x_nchw.reshape(rows, hw)
    gate_rc = x_gate_nchw.reshape(rows, 1)

    # Pick a row tile: a few blocks for pipelining, multiple of 8 sublanes,
    # dividing rows exactly; otherwise fall back to the full extent.
    tr = rows
    for nb in (4, 2):
        if rows % nb == 0 and (rows // nb) % 8 == 0:
            tr = rows // nb
            break
    grid = (rows // tr,)

    out_rc = pl.pallas_call(
        _sigmoid_mul_kernel,
        out_shape=jax.ShapeDtypeStruct((rows, hw), x_nchw.dtype),
        grid_spec=pl.GridSpec(
            grid=grid,
            in_specs=[
                pl.BlockSpec((tr, 1), lambda i: (i, 0)),   # gate column
                pl.BlockSpec((tr, hw), lambda i: (i, 0)),  # activation tile
            ],
            out_specs=pl.BlockSpec((tr, hw), lambda i: (i, 0)),
        ),
        compiler_params=pltpu.CompilerParams(
            dimension_semantics=("parallel",)
        ),
    )(gate_rc, x_rc)

    # Free view back to NCHW.
    return out_rc.reshape(N, C, H, W)


if __name__ == "__main__":
    key = jax.random.PRNGKey(0)
    k1, k2 = jax.random.split(key)

    # Shapes from the module: x609: [1, 2304, 7, 7], x613: [1, 2304, 1, 1]
    N, C, H, W = 1, 2304, 7, 7
    x609 = jax.random.normal(k1, (N, C, H, W), dtype=jnp.float32)
    x613 = jax.random.normal(k2, (N, C, 1, 1), dtype=jnp.float32)

    out = sigmoid_mul(x613, x609)
    out = jax.block_until_ready(out)

    # reference check against plain JAX
    ref = jax.nn.sigmoid(x613) * x609
    assert out.shape == ref.shape
    assert jnp.allclose(out, ref, atol=1e-6, rtol=1e-6)

    print("KERNEL_OK")
</pallas_src>

<mosaic_0001>
module attributes {stable_mosaic.version = 11 : i64} {
  func.func @_sigmoid_mul_kernel(%arg0: i32, %arg1: memref<576x1xf32, #tpu.memory_space<vmem>>, %arg2: memref<576x49xf32, #tpu.memory_space<vmem>>, %arg3: memref<576x49xf32, #tpu.memory_space<vmem>>) attributes {dimension_semantics = [#tpu.dimension_semantics<parallel>], iteration_bounds = array<i64: 4>, scalar_prefetch = 0 : i64, scratch_operands = 0 : i64, tpu.core_type = #tpu.core_type<tc>, window_params = [{transform_indices = @transform_0, window_bounds = array<i64: 576, 1>}, {transform_indices = @transform_1, window_bounds = array<i64: 576, 49>}, {transform_indices = @transform_2, window_bounds = array<i64: 576, 49>}]} {
    %c0 = arith.constant 0 : index
    %c0_0 = arith.constant 0 : index
    %0 = vector.load %arg1[%c0, %c0_0] : memref<576x1xf32, #tpu.memory_space<vmem>>, vector<576x1xf32>
    %1 = arith.negf %0 : vector<576x1xf32>
    %2 = math.exp %1 : vector<576x1xf32>
    %cst = arith.constant 1.000000e+00 : f32
    %3 = vector.broadcast %cst : f32 to vector<576x1xf32>
    %4 = arith.addf %3, %2 : vector<576x1xf32>
    %5 = arith.divf %3, %4 : vector<576x1xf32>
    %c0_1 = arith.constant 0 : index
    %c0_2 = arith.constant 0 : index
    %6 = vector.load %arg2[%c0_1, %c0_2] : memref<576x49xf32, #tpu.memory_space<vmem>>, vector<576x49xf32>
    %7 = vector.broadcast %5 : vector<576x1xf32> to vector<576x49xf32>
    %8 = arith.mulf %7, %6 : vector<576x49xf32>
    %c0_3 = arith.constant 0 : index
    %c0_4 = arith.constant 0 : index
    %9 = vector.load %arg3[%c0_3, %c0_4] : memref<576x49xf32, #tpu.memory_space<vmem>>, vector<576x49xf32>
    tpu.vector_store %arg3[%c0_3, %c0_4], %8 {strides = array<i32>} : memref<576x49xf32, #tpu.memory_space<vmem>>, vector<576x49xf32>,
    return
  }
  func.func @transform_0(%arg0: i32) -> (i32, i32) {
    %c0_i32 = arith.constant 0 : i32
    %c0_i32_0 = arith.constant 0 : i32
    return %arg0, %c0_i32 : i32, i32
  }
  func.func @transform_1(%arg0: i32) -> (i32, i32) {
    %c0_i32 = arith.constant 0 : i32
    %c0_i32_0 = arith.constant 0 : i32
    return %arg0, %c0_i32 : i32, i32
  }
  func.func @transform_2(%arg0: i32) -> (i32, i32) {
    %c0_i32 = arith.constant 0 : i32
    %c0_i32_0 = arith.constant 0 : i32
    return %arg0, %c0_i32 : i32, i32
  }
}

</mosaic_0001>

<bundles_post_ra>
// kernel: sigmoid_mul.1
= control target key start
LH: loop header
LB: loop body
LE: loop exit
PB: predicated region body
PF: predicated region fallthrough
CT: control target
= control target key end

     0   :  { %s1723_s9 = smov 0   ;;  %s2042_s0 = inlined_call_operand.vmem [shape: f32[2304,1], index: 0, kind: input, shape index: {}]   ;;  %s2043_s1 = inlined_call_operand.vmem [shape: f32[2304,49], index: 1, kind: input, shape index: {}]   ;;  %s2044_s2 = inlined_call_operand.vmem [shape: f32[2304,49], index: 2, kind: output, shape index: {}]  }
   0x1 LB: > { %s1318_s10 = sadd.s32 4294967295, %s1705_s9   ;;  %p1322_p0 = scmp.ge.s32.totalorder %s1705_s9, 1  ;;  %s1705_s9 = sphi %s1723_s9, %s12_s9  }
   0x2   : > { %p124_p1 = scmp.lt.s32.totalorder %s1705_s9, 5 }
   0x4   : > { %p125_p2 = pnand %p1322_p0, %p124_p1 }
   0x5   : > { %s151_s11 = smul.u32 (!%p125_p2), 72, %s1318_s10  ;;  %v1707_v0 = vmov (!%p125_p2), 0   ;;  %vm1177_vm0 = vcmask (!%p125_p2), 400384  }
   0x6   : > { %128 = sbr.rel (%p125_p2) target bundleno = 316 (0x13c), region = 28  ;;  %1410 = vset.pattern.permute.xlu1 (!%p125_p2), %v1707_v0  ;;  %1409 = vset.pattern.permute.xlu0 (!%p125_p2), %v1707_v0 }
   0x7   : > { %p152_p3 = scmp.lt.s32.totalorder (!%p125_p2), %s151_s11, 287 }
   0xd   : > { %s2046_s11 = smov (!%p152_p3, %s151_s11), 287 }
   0xe   : > { %s1731_s12 = sshll.u32 %s2046_s11, 3 }
   0xf   : > { %s1737_s15 = scalar_lea.vmem %s2042_s0, %s1731_s12  ;;  %s1815_s18 = scalar_lea.vmem %s2043_s1, %s1731_s12 }
  0x10   : > { %v171_v1 = vld [vmem:[%s1737_s15 + $0x10] sm:$0xff]  ;;  %v169_v2 = vld [vmem:[%s1737_s15] sm:$0xff]  ;;  %v172_v3 = vld [vmem:[%s1737_s15 + $0x18] sm:$0xff]  ;;  %s1823_s21 = scalar_lea.vmem %s2044_s2, %s1731_s12 }
  0x11   : > { %v1328_v4 = vmul.f32 -1.442695, %v171_v1  ;;  %v1326_v5 = vmul.f32 -1.442695, %v169_v2  ;;  %v1329_v6 = vmul.f32 -1.442695, %v172_v3 }
  0x12   : > { %v170_v7 = vld [vmem:[%s1737_s15 + $0x8] sm:$0xff]  ;;  %v173_v9 = vld [vmem:[%s1737_s15 + $0x20] sm:$0xff]  ;;  %v176_v13 = vld [vmem:[%s1737_s15 + $0x38] sm:$0xff] }
  0x13   : > { %v174_v8 = vld [vmem:[%s1737_s15 + $0x28] sm:$0xff]  ;;  %1411 = vpow2.f32 %v1328_v4  ;;  %v1327_v10 = vmul.f32 -1.442695, %v170_v7  ;;  %v1330_v12 = vmul.f32 -1.442695, %v173_v9  ;;  %v175_v14 = vld [vmem:[%s1737_s15 + $0x30] sm:$0xff] }
  0x14   : > { %v1331_v11 = vmul.f32 -1.442695, %v174_v8  ;;  %1413 = vpow2.f32 %v1326_v5  ;;  %v178_v15 = vld [vmem:[%s1737_s15 + $0x48] sm:$0xff]  ;;  %v1333_v16 = vmul.f32 -1.442695, %v176_v13  ;;  %v177_v18 = vld [vmem:[%s1737_s15 + $0x40] sm:$0xff] }
  0x15   : > { %1415 = vpow2.f32 %v1329_v6  ;;  %v1332_v17 = vmul.f32 -1.442695, %v175_v14  ;;  %v180_v19 = vld [vmem:[%s1737_s15 + $0x58] sm:$0xff]  ;;  %v1335_v20 = vmul.f32 -1.442695, %v178_v15  ;;  %v179_v21 = vld [vmem:[%s1737_s15 + $0x50] sm:$0xff] }
  0x16   : > { %1417 = vpow2.f32 %v1327_v10  ;;  %v1334_v22 = vmul.f32 -1.442695, %v177_v18  ;;  %v182_v23 = vld [vmem:[%s1737_s15 + $0x68] sm:$0xff]  ;;  %v1337_v24 = vmul.f32 -1.442695, %v180_v19  ;;  %v181_v46 = vld [vmem:[%s1737_s15 + $0x60] sm:$0xff] }
  0x17   : > { %1419 = vpow2.f32 %v1331_v11  ;;  %v1336_v25 = vmul.f32 -1.442695, %v179_v21  ;;  %v1339_v26 = vmul.f32 -1.442695, %v182_v23  ;;  %v184_v49 = vld [vmem:[%s1737_s15 + $0x78] sm:$0xff]  ;;  %v183_v52 = vld [vmem:[%s1737_s15 + $0x70] sm:$0xff] }
  0x18   : > { %1421 = vpow2.f32 %v1330_v12  ;;  %v1338_v55 = vmul.f32 -1.442695, %v181_v46  ;;  %v186_v56 = vld [vmem:[%s1737_s15 + $0x88] sm:$0xff]  ;;  %v1341_v59 = vmul.f32 -1.442695, %v184_v49  ;;  %v185_v60 = vld [vmem:[%s1737_s15 + $0x80] sm:$0xff] }
  0x19   : > { %1423 = vpow2.f32 %v1333_v16  ;;  %v1340_v62 = vmul.f32 -1.442695, %v183_v52  ;;  %v188_v63 = vld [vmem:[%s1737_s15 + $0x98] sm:$0xff]  ;;  %v1343_v1 = vmul.f32 -1.442695, %v186_v56  ;;  %v187_v2 = vld [vmem:[%s1737_s15 + $0x90] sm:$0xff] }
  0x1a   : > { %1425 = vpow2.f32 %v1332_v17  ;;  %v1342_v4 = vmul.f32 -1.442695, %v185_v60  ;;  %v190_v5 = vld [vmem:[%s1737_s15 + $0xa8] sm:$0xff]  ;;  %v1345_v7 = vmul.f32 -1.442695, %v188_v63  ;;  %v189_v8 = vld [vmem:[%s1737_s15 + $0xa0] sm:$0xff] }
  0x1b   : > { %1427 = vpow2.f32 %v1335_v20  ;;  %v1344_v10 = vmul.f32 -1.442695, %v187_v2  ;;  %v192_v11 = vld [vmem:[%s1737_s15 + $0xb8] sm:$0xff]  ;;  %v1347_v13 = vmul.f32 -1.442695, %v190_v5  ;;  %v191_v14 = vld [vmem:[%s1737_s15 + $0xb0] sm:$0xff] }
  0x1c   : > { %1429 = vpow2.f32 %v1334_v22  ;;  %v1346_v16 = vmul.f32 -1.442695, %v189_v8  ;;  %v194_v17 = vld [vmem:[%s1737_s15 + $0xc8] sm:$0xff]  ;;  %v1349_v19 = vmul.f32 -1.442695, %v192_v11  ;;  %v193_v20 = vld [vmem:[%s1737_s15 + $0xc0] sm:$0xff] }
  0x1d   : > { %v1412_v27 = vpop.eup %1411  ;;  %1431 = vpow2.f32 %v1337_v24  ;;  %v1348_v22 = vmul.f32 -1.442695, %v191_v14  ;;  %v1351_v24 = vmul.f32 -1.442695, %v194_v17 }
  0x1e   : > { %v1414_v28 = vpop.eup %1413  ;;  %v459_v29 = vadd.f32 1.0, %v1412_v27  ;;  %1433 = vpow2.f32 %v1336_v25 }
  0x1f   : > { %v1416_v30 = vpop.eup %1415  ;;  %v457_v31 = vadd.f32 1.0, %v1414_v28  ;;  %1435 = vpow2.f32 %v1339_v26  ;;  %v1350_v26 = vmul.f32 -1.442695, %v193_v20 }
  0x20   : > { %v1418_v32 = vpop.eup %1417  ;;  %1437 = vrcp.f32 %v459_v29  ;;  %v460_v33 = vadd.f32 1.0, %v1416_v30 }
  0x21   : > { %v1420_v34 = vpop.eup %1419  ;;  %1439 = vrcp.f32 %v457_v31  ;;  %v458_v35 = vadd.f32 1.0, %v1418_v32 }
  0x22   : > { %v1422_v36 = vpop.eup %1421  ;;  %1441 = vrcp.f32 %v460_v33  ;;  %v462_v37 = vadd.f32 1.0, %v1420_v34 }
  0x23   : > { %v1424_v38 = vpop.eup %1423  ;;  %1443 = vrcp.f32 %v458_v35  ;;  %v461_v39 = vadd.f32 1.0, %v1422_v36 }
  0x24   : > { %v1426_v40 = vpop.eup %1425  ;;  %1445 = vrcp.f32 %v462_v37  ;;  %v464_v41 = vadd.f32 1.0, %v1424_v38 }
  0x25   : > { %v1428_v42 = vpop.eup %1427  ;;  %1447 = vrcp.f32 %v461_v39  ;;  %v463_v43 = vadd.f32 1.0, %v1426_v40 }
  0x26   : > { %v1430_v44 = vpop.eup %1429  ;;  %1449 = vrcp.f32 %v464_v41  ;;  %v466_v45 = vadd.f32 1.0, %v1428_v42 }
  0x27   : > { %v1432_v47 = vpop.eup %1431  ;;  %1451 = vrcp.f32 %v463_v43  ;;  %v465_v48 = vadd.f32 1.0, %v1430_v44 }
  0x28   : > { %v1434_v50 = vpop.eup %1433  ;;  %1453 = vrcp.f32 %v466_v45  ;;  %v468_v51 = vadd.f32 1.0, %v1432_v47  ;;  %v196_v47 = vld [vmem:[%s1737_s15 + $0xd8] sm:$0xff] }
  0x29   : > { %v1436_v53 = vpop.eup %1435  ;;  %1455 = vrcp.f32 %v465_v48  ;;  %v467_v54 = vadd.f32 1.0, %v1434_v50  ;;  %v195_v50 = vld [vmem:[%s1737_s15 + $0xd0] sm:$0xff]  ;;  %v1353_v56 = vmul.f32 -1.442695, %v196_v47 }
  0x2a   : > { %v1438_v57 = vpop.eup %1437  ;;  %1457 = vrcp.f32 %v468_v51  ;;  %v470_v58 = vadd.f32 1.0, %v1436_v53  ;;  %v198_v53 = vld [vmem:[%s1737_s15 + $0xe8] sm:$0xff]  ;;  %v1352_v60 = vmul.f32 -1.442695, %v195_v50 }
  0x2b   : > { %v1440_v61 = vpop.eup %1439  ;;  %757 = vperm.xlu1 %1410, %v1438_v57   ;;  %1459 = vrcp.f32 %v467_v54  ;;  %v197_v57 = vld [vmem:[%s1737_s15 + $0xe0] sm:$0xff]  ;;  %v1355_v63 = vmul.f32 -1.442695, %v198_v53 }
  0x2c   : > { %v1442_v0 = vpop.eup %1441  ;;  %747 = vperm.xlu0 %1409, %v1440_v61   ;;  %1461 = vrcp.f32 %v470_v58  ;;  %v200_v61 = vld [vmem:[%s1737_s15 + $0xf8] sm:$0xff]  ;;  %v1354_v2 = vmul.f32 -1.442695, %v197_v57 }
  0x2d   : > { %v1444_v3 = vpop.eup %1443  ;;  %1463 = vpow2.f32 %v1338_v55  ;;  %v1357_v5 = vmul.f32 -1.442695, %v200_v61 }
  0x2e   : > { %v1446_v6 = vpop.eup %1445  ;;  %1465 = vpow2.f32 %v1341_v59 }
  0x2f   : > { %v1448_v9 = vpop.eup %1447  ;;  %762 = vperm.xlu1 %1410, %v1442_v0   ;;  %1467 = vpow2.f32 %v1340_v62  ;;  %v199_v0 = vld [vmem:[%s1737_s15 + $0xf0] sm:$0xff] }
  0x30   : > { %v1450_v12 = vpop.eup %1449  ;;  %752 = vperm.xlu0 %1409, %v1444_v3   ;;  %1469 = vpow2.f32 %v1343_v1  ;;  %v202_v3 = vld [vmem:[%s1737_s15 + $0x108] sm:$0xff]  ;;  %v1356_v8 = vmul.f32 -1.442695, %v199_v0 }
  0x31   : > { %v1452_v15 = vpop.eup %1451  ;;  %1471 = vpow2.f32 %v1342_v4  ;;  %v1359_v11 = vmul.f32 -1.442695, %v202_v3 }
  0x32   : > { %v1454_v18 = vpop.eup %1453  ;;  %1473 = vpow2.f32 %v1345_v7 }
  0x33   : > { %v1456_v21 = vpop.eup %1455  ;;  %772 = vperm.xlu1 %1410, %v1446_v6   ;;  %1475 = vpow2.f32 %v1344_v10  ;;  %v201_v6 = vld [vmem:[%s1737_s15 + $0x100] sm:$0xff] }
  0x34   : > { %v1458_v23 = vpop.eup %1457  ;;  %767 = vperm.xlu0 %1409, %v1448_v9   ;;  %1477 = vpow2.f32 %v1347_v13  ;;  %v204_v9 = vld [vmem:[%s1737_s15 + $0x118] sm:$0xff]  ;;  %v1358_v14 = vmul.f32 -1.442695, %v201_v6 }
  0x35   : > { %v1460_v25 = vpop.eup %1459  ;;  %1479 = vpow2.f32 %v1346_v16  ;;  %v1361_v17 = vmul.f32 -1.442695, %v204_v9 }
  0x36   : > { %v1462_v27 = vpop.eup %1461  ;;  %1481 = vpow2.f32 %v1349_v19 }
  0x37   : > { %v1464_v28 = vpop.eup %1463  ;;  %782 = vperm.xlu1 %1410, %v1450_v12   ;;  %1483 = vpow2.f32 %v1348_v22  ;;  %v203_v12 = vld [vmem:[%s1737_s15 + $0x110] sm:$0xff] }
  0x38   : > { %v1466_v29 = vpop.eup %1465  ;;  %777 = vperm.xlu0 %1409, %v1452_v15   ;;  %v469_v30 = vadd.f32 1.0, %v1464_v28  ;;  %1485 = vpow2.f32 %v1351_v24  ;;  %v206_v15 = vld [vmem:[%s1737_s15 + $0x128] sm:$0xff]  ;;  %v1360_v20 = vmul.f32 -1.442695, %v203_v12 }
  0x39   : > { %v1468_v31 = vpop.eup %1467  ;;  %v472_v32 = vadd.f32 1.0, %v1466_v29  ;;  %1487 = vpow2.f32 %v1350_v26 }
  0x3a   : > { %v1470_v33 = vpop.eup %1469  ;;  %1489 = vrcp.f32 %v469_v30  ;;  %v471_v34 = vadd.f32 1.0, %v1468_v31 }
  0x3b   : > { %v1472_v35 = vpop.eup %1471  ;;  %792 = vperm.xlu1 %1410, %v1454_v18   ;;  %1491 = vrcp.f32 %v472_v32  ;;  %v474_v36 = vadd.f32 1.0, %v1470_v33  ;;  %v205_v18 = vld [vmem:[%s1737_s15 + $0x120] sm:$0xff] }
  0x3c   : > { %v1474_v37 = vpop.eup %1473  ;;  %787 = vperm.xlu0 %1409, %v1456_v21   ;;  %1493 = vrcp.f32 %v471_v34  ;;  %v473_v38 = vadd.f32 1.0, %v1472_v35  ;;  %v208_v21 = vld [vmem:[%s1737_s15 + $0x138] sm:$0xff] }
  0x3d   : > { %v1476_v39 = vpop.eup %1475  ;;  %1495 = vrcp.f32 %v474_v36  ;;  %v476_v40 = vadd.f32 1.0, %v1474_v37 }
  0x3e   : > { %v1478_v41 = vpop.eup %1477  ;;  %1497 = vrcp.f32 %v473_v38  ;;  %v475_v42 = vadd.f32 1.0, %v1476_v39 }
  0x3f   : > { %v1480_v43 = vpop.eup %1479  ;;  %802 = vperm.xlu1 %1410, %v1458_v23   ;;  %1499 = vrcp.f32 %v476_v40  ;;  %v478_v44 = vadd.f32 1.0, %v1478_v41  ;;  %v1363_v23 = vmul.f32 -1.442695, %v206_v15 }
  0x40   : > { %v1482_v45 = vpop.eup %1481  ;;  %797 = vperm.xlu0 %1409, %v1460_v25   ;;  %1501 = vrcp.f32 %v475_v42  ;;  %v477_v46 = vadd.f32 1.0, %v1480_v43  ;;  %v1362_v25 = vmul.f32 -1.442695, %v205_v18 }
  0x41   : > { %v1484_v48 = vpop.eup %1483  ;;  %1503 = vrcp.f32 %v478_v44  ;;  %v480_v49 = vadd.f32 1.0, %v1482_v45 }
  0x42   : > { %v1486_v51 = vpop.eup %1485  ;;  %1505 = vrcp.f32 %v477_v46  ;;  %v479_v52 = vadd.f32 1.0, %v1484_v48  ;;  %v207_v48 = vld [vmem:[%s1737_s15 + $0x130] sm:$0xff] }
  0x43   : > { %v1488_v54 = vpop.eup %1487  ;;  %812 = vperm.xlu1 %1410, %v1462_v27   ;;  %1507 = vrcp.f32 %v480_v49  ;;  %v482_v55 = vadd.f32 1.0, %v1486_v51  ;;  %v1365_v27 = vmul.f32 -1.442695, %v208_v21  ;;  %v210_v51 = vld [vmem:[%s1737_s15 + $0x148] sm:$0xff]  ;;  %v1364_v57 = vmul.f32 -1.442695, %v207_v48 }
  0x44   : > { %v1490_v58 = vpop.eup %1489  ;;  %1509 = vrcp.f32 %v479_v52  ;;  %v481_v59 = vadd.f32 1.0, %v1488_v54  ;;  %v209_v54 = vld [vmem:[%s1737_s15 + $0x140] sm:$0xff]  ;;  %v1367_v61 = vmul.f32 -1.442695, %v210_v51 }
  0x45   : > { %v1492_v62 = vpop.eup %1491  ;;  %807 = vperm.xlu0 %1409, %v1490_v58   ;;  %1511 = vrcp.f32 %v482_v55  ;;  %v212_v58 = vld [vmem:[%s1737_s15 + $0x158] sm:$0xff]  ;;  %v1366_v0 = vmul.f32 -1.442695, %v209_v54 }
  0x46   : > { %v1494_v1 = vpop.eup %1493  ;;  %1513 = vrcp.f32 %v481_v59  ;;  %v1369_v3 = vmul.f32 -1.442695, %v212_v58 }
  0x47   : > { %v1496_v4 = vpop.eup %1495  ;;  %822 = vperm.xlu1 %1410, %v1492_v62   ;;  %1515 = vpow2.f32 %v1353_v56  ;;  %v211_v62 = vld [vmem:[%s1737_s15 + $0x150] sm:$0xff] }
  0x48   : > { %v1498_v7 = vpop.eup %1497  ;;  %1517 = vpow2.f32 %v1352_v60  ;;  %v1368_v6 = vmul.f32 -1.442695, %v211_v62 }
  0x49   : > { %v1500_v10 = vpop.eup %1499  ;;  %817 = vperm.xlu0 %1409, %v1494_v1   ;;  %1519 = vpow2.f32 %v1355_v63  ;;  %v214_v1 = vld [vmem:[%s1737_s15 + $0x168] sm:$0xff] }
  0x4a   : > { %v1502_v13 = vpop.eup %1501  ;;  %1521 = vpow2.f32 %v1354_v2  ;;  %v1371_v9 = vmul.f32 -1.442695, %v214_v1 }
  0x4b   : > { %v1504_v16 = vpop.eup %1503  ;;  %832 = vperm.xlu1 %1410, %v1496_v4   ;;  %1523 = vpow2.f32 %v1357_v5  ;;  %v213_v4 = vld [vmem:[%s1737_s15 + $0x160] sm:$0xff] }
  0x4c   : > { %v1506_v19 = vpop.eup %1505  ;;  %1525 = vpow2.f32 %v1356_v8  ;;  %v1370_v12 = vmul.f32 -1.442695, %v213_v4 }
  0x4d   : > { %v1508_v22 = vpop.eup %1507  ;;  %827 = vperm.xlu0 %1409, %v1498_v7   ;;  %1527 = vpow2.f32 %v1359_v11  ;;  %v216_v7 = vld [vmem:[%s1737_s15 + $0x178] sm:$0xff] }
  0x4e   : > { %v1510_v24 = vpop.eup %1509  ;;  %1529 = vpow2.f32 %v1358_v14  ;;  %v1373_v15 = vmul.f32 -1.442695, %v216_v7 }
  0x4f   : > { %v1512_v26 = vpop.eup %1511  ;;  %842 = vperm.xlu1 %1410, %v1500_v10   ;;  %1531 = vpow2.f32 %v1361_v17  ;;  %v215_v10 = vld [vmem:[%s1737_s15 + $0x170] sm:$0xff] }
  0x50   : > { %v1514_v28 = vpop.eup %1513  ;;  %1533 = vpow2.f32 %v1360_v20  ;;  %v1372_v18 = vmul.f32 -1.442695, %v215_v10 }
  0x51   : > { %v1516_v29 = vpop.eup %1515  ;;  %837 = vperm.xlu0 %1409, %v1502_v13   ;;  %1535 = vpow2.f32 %v1363_v23  ;;  %v218_v13 = vld [vmem:[%s1737_s15 + $0x188] sm:$0xff] }
  0x52   : > { %v1518_v30 = vpop.eup %1517  ;;  %v484_v31 = vadd.f32 1.0, %v1516_v29  ;;  %1537 = vpow2.f32 %v1362_v25  ;;  %v1375_v21 = vmul.f32 -1.442695, %v218_v13 }
  0x53   : > { %v1520_v32 = vpop.eup %1519  ;;  %852 = vperm.xlu1 %1410, %v1504_v16   ;;  %v483_v33 = vadd.f32 1.0, %v1518_v30  ;;  %1539 = vpow2.f32 %v1365_v27  ;;  %v217_v16 = vld [vmem:[%s1737_s15 + $0x180] sm:$0xff] }
  0x54   : > { %v1522_v34 = vpop.eup %1521  ;;  %1541 = vrcp.f32 %v484_v31  ;;  %v486_v35 = vadd.f32 1.0, %v1520_v32 }
  0x55   : > { %v1524_v36 = vpop.eup %1523  ;;  %847 = vperm.xlu0 %1409, %v1506_v19   ;;  %1543 = vrcp.f32 %v483_v33  ;;  %v485_v37 = vadd.f32 1.0, %v1522_v34  ;;  %v220_v19 = vld [vmem:[%s1737_s15 + $0x198] sm:$0xff] }
  0x56   : > { %v1526_v38 = vpop.eup %1525  ;;  %1545 = vrcp.f32 %v486_v35  ;;  %v488_v39 = vadd.f32 1.0, %v1524_v36 }
  0x57   : > { %v1528_v40 = vpop.eup %1527  ;;  %862 = vperm.xlu1 %1410, %v1508_v22   ;;  %1547 = vrcp.f32 %v485_v37  ;;  %v487_v41 = vadd.f32 1.0, %v1526_v38  ;;  %v219_v22 = vld [vmem:[%s1737_s15 + $0x190] sm:$0xff] }
  0x58   : > { %v1530_v42 = vpop.eup %1529  ;;  %1549 = vrcp.f32 %v488_v39  ;;  %v490_v43 = vadd.f32 1.0, %v1528_v40 }
  0x59   : > { %v1532_v44 = vpop.eup %1531  ;;  %857 = vperm.xlu0 %1409, %v1510_v24   ;;  %1551 = vrcp.f32 %v487_v41  ;;  %v489_v45 = vadd.f32 1.0, %v1530_v42  ;;  %v1374_v24 = vmul.f32 -1.442695, %v217_v16 }
  0x5a   : > { %v1534_v46 = vpop.eup %1533  ;;  %1553 = vrcp.f32 %v490_v43  ;;  %v492_v47 = vadd.f32 1.0, %v1532_v44 }
  0x5b   : > { %v1536_v49 = vpop.eup %1535  ;;  %872 = vperm.xlu1 %1410, %v1512_v26   ;;  %1555 = vrcp.f32 %v489_v45  ;;  %v491_v50 = vadd.f32 1.0, %v1534_v46  ;;  %v1377_v26 = vmul.f32 -1.442695, %v220_v19 }
  0x5c   : > { %v1538_v52 = vpop.eup %1537  ;;  %1557 = vrcp.f32 %v492_v47  ;;  %v494_v53 = vadd.f32 1.0, %v1536_v49  ;;  %v222_v49 = vld [vmem:[%s1737_s15 + $0x1a8] sm:$0xff] }
  0x5d   : > { %v1540_v55 = vpop.eup %1539  ;;  %867 = vperm.xlu0 %1409, %v1514_v28   ;;  %1559 = vrcp.f32 %v491_v50  ;;  %v493_v56 = vadd.f32 1.0, %v1538_v52  ;;  %v1376_v28 = vmul.f32 -1.442695, %v219_v22  ;;  %v221_v52 = vld [vmem:[%s1737_s15 + $0x1a0] sm:$0xff]  ;;  %v1379_v58 = vmul.f32 -1.442695, %v222_v49 }
  0x5e   : > { %v1542_v59 = vpop.eup %1541  ;;  %1561 = vrcp.f32 %v494_v53  ;;  %v496_v60 = vadd.f32 1.0, %v1540_v55  ;;  %v224_v55 = vld [vmem:[%s1737_s15 + $0x1b8] sm:$0xff]  ;;  %v1378_v62 = vmul.f32 -1.442695, %v221_v52 }
  0x5f   : > { %v1544_v63 = vpop.eup %1543  ;;  %882 = vperm.xlu1 %1410, %v1542_v59   ;;  %1563 = vrcp.f32 %v493_v56  ;;  %v223_v59 = vld [vmem:[%s1737_s15 + $0x1b0] sm:$0xff]  ;;  %v1381_v1 = vmul.f32 -1.442695, %v224_v55 }
  0x60   : > { %v1546_v2 = vpop.eup %1545  ;;  %1565 = vrcp.f32 %v496_v60  ;;  %v1380_v4 = vmul.f32 -1.442695, %v223_v59  ;;  %v235_v55 = vld [vmem:[%s1737_s15 + $0x210] sm:$0xff] }
  0x61   : > { %v1548_v5 = vpop.eup %1547  ;;  %877 = vperm.xlu0 %1409, %v1544_v63   ;;  %1567 = vpow2.f32 %v1364_v57  ;;  %v226_v63 = vld [vmem:[%s1737_s15 + $0x1c8] sm:$0xff] }
  0x62   : > { %v1550_v8 = vpop.eup %1549  ;;  %1569 = vpow2.f32 %v1367_v61  ;;  %v1383_v7 = vmul.f32 -1.442695, %v226_v63  ;;  %v240_v63 = vld [vmem:[%s1737_s15 + $0x238] sm:$0xff] }
  0x63   : > { %v1552_v11 = vpop.eup %1551  ;;  %892 = vperm.xlu1 %1410, %v1546_v2   ;;  %1571 = vpow2.f32 %v1366_v0  ;;  %v225_v2 = vld [vmem:[%s1737_s15 + $0x1c0] sm:$0xff] }
  0x64   : > { %v1554_v14 = vpop.eup %1553  ;;  %1573 = vpow2.f32 %v1369_v3  ;;  %v1382_v10 = vmul.f32 -1.442695, %v225_v2  ;;  %v239_v2 = vld [vmem:[%s1737_s15 + $0x230] sm:$0xff] }
  0x65   : > { %v1556_v17 = vpop.eup %1555  ;;  %887 = vperm.xlu0 %1409, %v1548_v5   ;;  %1575 = vpow2.f32 %v1368_v6  ;;  %v228_v5 = vld [vmem:[%s1737_s15 + $0x1d8] sm:$0xff] }
  0x66   : > { %v1558_v20 = vpop.eup %1557  ;;  %1577 = vpow2.f32 %v1371_v9  ;;  %v1385_v13 = vmul.f32 -1.442695, %v228_v5 }
  0x67   : > { %v1560_v23 = vpop.eup %1559  ;;  %902 = vperm.xlu1 %1410, %v1550_v8   ;;  %1579 = vpow2.f32 %v1370_v12  ;;  %v227_v8 = vld [vmem:[%s1737_s15 + $0x1d0] sm:$0xff] }
  0x68   : > { %v1562_v25 = vpop.eup %1561  ;;  %1581 = vpow2.f32 %v1373_v15  ;;  %v1384_v16 = vmul.f32 -1.442695, %v227_v8  ;;  %v1396_v8 = vmul.f32 -1.442695, %v239_v2  ;;  %v681_v2 = vld [vmem:[%s1815_s18 + $0x40] sm:$0xff] }
  0x69   : > { %v1564_v27 = vpop.eup %1563  ;;  %897 = vperm.xlu0 %1409, %v1552_v11   ;;  %1583 = vpow2.f32 %v1372_v18  ;;  %v230_v11 = vld [vmem:[%s1737_s15 + $0x1e8] sm:$0xff] }
  0x6a   : > { %v1566_v29 = vpop.eup %1565  ;;  %1585 = vpow2.f32 %v1375_v21  ;;  %v1387_v19 = vmul.f32 -1.442695, %v230_v11 }
  0x6b   : > { %v1568_v30 = vpop.eup %1567  ;;  %912 = vperm.xlu1 %1410, %v1554_v14   ;;  %1587 = vpow2.f32 %v1374_v24  ;;  %v229_v14 = vld [vmem:[%s1737_s15 + $0x1e0] sm:$0xff] }
  0x6c   : > { %v1570_v31 = vpop.eup %1569  ;;  %v495_v32 = vadd.f32 1.0, %v1568_v30  ;;  %1589 = vpow2.f32 %v1377_v26  ;;  %v1386_v21 = vmul.f32 -1.442695, %v229_v14 }
  0x6d   : > { %v1572_v33 = vpop.eup %1571  ;;  %907 = vperm.xlu0 %1409, %v1556_v17   ;;  %v498_v34 = vadd.f32 1.0, %v1570_v31  ;;  %1591 = vpow2.f32 %v1376_v28  ;;  %v232_v17 = vld [vmem:[%s1737_s15 + $0x1f8] sm:$0xff]  ;;  %v234_v31 = vld [vmem:[%s1737_s15 + $0x208] sm:$0xff] }
  0x6e   : > { %v1574_v35 = vpop.eup %1573  ;;  %1593 = vrcp.f32 %v495_v32  ;;  %v497_v36 = vadd.f32 1.0, %v1572_v33 }
  0x6f   : > { %v1576_v37 = vpop.eup %1575  ;;  %922 = vperm.xlu1 %1410, %v1558_v20   ;;  %1595 = vrcp.f32 %v498_v34  ;;  %v500_v38 = vadd.f32 1.0, %v1574_v35 }
  0x70   : > { %v1578_v39 = vpop.eup %1577  ;;  %1597 = vrcp.f32 %v497_v36  ;;  %v499_v40 = vadd.f32 1.0, %v1576_v37 }
  0x71   : > { %v1580_v41 = vpop.eup %1579  ;;  %917 = vperm.xlu0 %1409, %v1560_v23   ;;  %1599 = vrcp.f32 %v500_v38  ;;  %v502_v42 = vadd.f32 1.0, %v1578_v39  ;;  %v1389_v23 = vmul.f32 -1.442695, %v232_v17  ;;  %v1391_v39 = vmul.f32 -1.442695, %v234_v31 }
  0x72   : > { %v1582_v43 = vpop.eup %1581  ;;  %1601 = vrcp.f32 %v499_v40  ;;  %v501_v44 = vadd.f32 1.0, %v1580_v41 }
  0x73   : > { %v1584_v45 = vpop.eup %1583  ;;  %932 = vperm.xlu1 %1410, %v1562_v25   ;;  %1603 = vrcp.f32 %v502_v42  ;;  %v504_v46 = vadd.f32 1.0, %v1582_v43 }
  0x74   : > { %v1586_v47 = vpop.eup %1585  ;;  %1605 = vrcp.f32 %v501_v44  ;;  %v503_v48 = vadd.f32 1.0, %v1584_v45 }
  0x75   : > { %v1588_v50 = vpop.eup %1587  ;;  %927 = vperm.xlu0 %1409, %v1564_v27   ;;  %1607 = vrcp.f32 %v504_v46  ;;  %v506_v51 = vadd.f32 1.0, %v1586_v47  ;;  %v231_v27 = vld [vmem:[%s1737_s15 + $0x1f0] sm:$0xff] }
  0x76   : > { %v1590_v53 = vpop.eup %1589  ;;  %1609 = vrcp.f32 %v503_v48  ;;  %v505_v54 = vadd.f32 1.0, %v1588_v50  ;;  %v1388_v34 = vmul.f32 -1.442695, %v231_v27  ;;  %v233_v50 = vld [vmem:[%s1737_s15 + $0x200] sm:$0xff] }
  0x77   : > { %v1592_v56 = vpop.eup %1591  ;;  %942 = vperm.xlu1 %1410, %v1566_v29   ;;  %1611 = vrcp.f32 %v506_v51  ;;  %v508_v57 = vadd.f32 1.0, %v1590_v53  ;;  %v236_v53 = vld [vmem:[%s1737_s15 + $0x218] sm:$0xff] }
  0x78   : > { %v1594_v60 = vpop.eup %1593  ;;  %1613 = vrcp.f32 %v505_v54  ;;  %v507_v61 = vadd.f32 1.0, %v1592_v56  ;;  %v1390_v56 = vmul.f32 -1.442695, %v233_v50  ;;  %v1393_v59 = vmul.f32 -1.442695, %v236_v53  ;;  %v678_v50 = vld [vmem:[%s1815_s18 + $0x28] sm:$0xff] }
  0x79   : > { %v1596_v0 = vpop.eup %1595  ;;  %937 = vperm.xlu0 %1409, %v1594_v60   ;;  %1615 = vrcp.f32 %v508_v57  ;;  %v238_v57 = vld [vmem:[%s1737_s15 + $0x228] sm:$0xff]  ;;  %v237_v60 = vld [vmem:[%s1737_s15 + $0x220] sm:$0xff] }
  0x7a   : > { %v1598_v3 = vpop.eup %1597  ;;  %1617 = vrcp.f32 %v507_v61 }
  0x7b   : > { %v1600_v6 = vpop.eup %1599  ;;  %952 = vperm.xlu1 %1410, %v1596_v0   ;;  %1619 = vpow2.f32 %v1379_v58 }
  0x7c   : > { %v1602_v9 = vpop.eup %1601  ;;  %1621 = vpow2.f32 %v1378_v62  ;;  %v1392_v62 = vmul.f32 -1.442695, %v235_v55 }
  0x7d   : > { %v1604_v12 = vpop.eup %1603  ;;  %947 = vperm.xlu0 %1409, %v1598_v3   ;;  %1623 = vpow2.f32 %v1381_v1  ;;  %v1395_v1 = vmul.f32 -1.442695, %v238_v57 }
  0x7e   : > { %v1606_v15 = vpop.eup %1605  ;;  %1625 = vpow2.f32 %v1380_v4  ;;  %v1394_v4 = vmul.f32 -1.442695, %v237_v60 }
  0x7f   : > { %v1608_v18 = vpop.eup %1607  ;;  %962 = vperm.xlu1 %1410, %v1600_v6   ;;  %1627 = vpow2.f32 %v1383_v7  ;;  %v1397_v6 = vmul.f32 -1.442695, %v240_v63 }
  0x80   : > { %v1610_v20 = vpop.eup %1609  ;;  %1629 = vpow2.f32 %v1382_v10 }
  0x81   : > { %v1612_v22 = vpop.eup %1611  ;;  %957 = vperm.xlu0 %1409, %v1602_v9   ;;  %1631 = vpow2.f32 %v1385_v13 }
  0x82   : > { %v1614_v24 = vpop.eup %1613  ;;  %1633 = vpow2.f32 %v1384_v16 }
  0x83   : > { %v1616_v25 = vpop.eup %1615  ;;  %972 = vperm.xlu1 %1410, %v1604_v12   ;;  %1635 = vpow2.f32 %v1387_v19 }
  0x84   : > { %v1618_v26 = vpop.eup %1617  ;;  %1637 = vpow2.f32 %v1386_v21 }
  0x85   : > { %v1620_v28 = vpop.eup %1619  ;;  %967 = vperm.xlu0 %1409, %v1606_v15   ;;  %1639 = vpow2.f32 %v1389_v23 }
  0x86   : > { %v1622_v29 = vpop.eup %1621  ;;  %v510_v30 = vadd.f32 1.0, %v1620_v28 }
  0x87   : > { %v1624_v32 = vpop.eup %1623  ;;  %982 = vperm.xlu1 %1410, %v1608_v18   ;;  %v509_v33 = vadd.f32 1.0, %v1622_v29 }
  0x88   : > { %v1626_v35 = vpop.eup %1625  ;;  %1641 = vrcp.f32 %v510_v30  ;;  %v512_v36 = vadd.f32 1.0, %v1624_v32 }
  0x89   : > { %v1628_v37 = vpop.eup %1627  ;;  %977 = vperm.xlu0 %1409, %v1610_v20   ;;  %1643 = vrcp.f32 %v509_v33  ;;  %v511_v38 = vadd.f32 1.0, %v1626_v35  ;;  %v675_v33 = vld [vmem:[%s1815_s18 + $0x10] sm:$0xff]  ;;  %v673_v35 = vld [vmem:[%s1815_s18] sm:$0xff] }
  0x8a   : > { %v1630_v40 = vpop.eup %1629  ;;  %1645 = vrcp.f32 %v512_v36  ;;  %v514_v41 = vadd.f32 1.0, %v1628_v37 }
  0x8b   : > { %v1632_v42 = vpop.eup %1631  ;;  %992 = vperm.xlu1 %1410, %v1612_v22   ;;  %v513_v43 = vadd.f32 1.0, %v1630_v40  ;;  %1647 = vpow2.f32 %v1388_v34 }
  0x8c   : > { %v1634_v44 = vpop.eup %1633  ;;  %1649 = vrcp.f32 %v511_v38  ;;  %v516_v45 = vadd.f32 1.0, %v1632_v42 }
  0x8d   : > { %v1636_v46 = vpop.eup %1635  ;;  %987 = vperm.xlu0 %1409, %v1614_v24   ;;  %v515_v47 = vadd.f32 1.0, %v1634_v44  ;;  %1651 = vpow2.f32 %v1391_v39 }
  0x8e   : > { %v1638_v48 = vpop.eup %1637  ;;  %1653 = vrcp.f32 %v514_v41  ;;  %v518_v49 = vadd.f32 1.0, %v1636_v46  ;;  %v676_v41 = vld [vmem:[%s1815_s18 + $0x18] sm:$0xff] }
  0x8f   : > { %v1640_v51 = vpop.eup %1639  ;;  %1002 = vperm.xlu1 %1410, %v1616_v25   ;;  %1655 = vrcp.f32 %v513_v43  ;;  %v517_v52 = vadd.f32 1.0, %v1638_v48  ;;  %v674_v43 = vld [vmem:[%s1815_s18 + $0x8] sm:$0xff] }
  0x90   : > { %1657 = vrcp.f32 %v516_v45  ;;  %v520_v54 = vadd.f32 1.0, %v1640_v51  ;;  %v677_v51 = vld [vmem:[%s1815_s18 + $0x20] sm:$0xff] }
  0x91   : > { %997 = vperm.xlu0 %1409, %v1618_v26   ;;  %1659 = vrcp.f32 %v515_v47 }
  0x92   : > { %v1642_v58 = vpop.eup %1641  ;;  %1661 = vrcp.f32 %v518_v49 }
  0x93   : > { %v1644_v61 = vpop.eup %1643  ;;  %1012 = vperm.xlu1 %1410, %v1642_v58   ;;  %1663 = vrcp.f32 %v517_v52  ;;  %v680_v58 = vld [vmem:[%s1815_s18 + $0x38] sm:$0xff] }
  0x94   : > { %v1646_v0 = vpop.eup %1645  ;;  %1665 = vrcp.f32 %v520_v54 }
  0x95   : > { %v1648_v3 = vpop.eup %1647  ;;  %1007 = vperm.xlu0 %1409, %v1644_v61   ;;  %1667 = vpow2.f32 %v1390_v56 }
  0x96   : > { %v1650_v5 = vpop.eup %1649  ;;  %1669 = vpow2.f32 %v1393_v59  ;;  %v519_v10 = vadd.f32 1.0, %v1648_v3  ;;  %v679_v59 = vld [vmem:[%s1815_s18 + $0x30] sm:$0xff] }
  0x97   : > { %v1652_v7 = vpop.eup %1651  ;;  %1022 = vperm.xlu1 %1410, %v1646_v0   ;;  %1671 = vpow2.f32 %v1392_v62 }
  0x98   : > { %v1654_v9 = vpop.eup %1653  ;;  %1673 = vpow2.f32 %v1395_v1  ;;  %v522_v13 = vadd.f32 1.0, %v1652_v7  ;;  %v682_v1 = vld [vmem:[%s1815_s18 + $0x48] sm:$0xff]  ;;  %v684_v7 = vld [vmem:[%s1815_s18 + $0x58] sm:$0xff] }
  0x99   : > { %v1656_v11 = vpop.eup %1655  ;;  %1017 = vperm.xlu0 %1409, %v1650_v5   ;;  %1675 = vpow2.f32 %v1394_v4 }
  0x9a   : > { %v1658_v12 = vpop.eup %1657  ;;  %1677 = vpow2.f32 %v1397_v6 }
  0x9b   : > { %v1660_v14 = vpop.eup %1659  ;;  %1032 = vperm.xlu1 %1410, %v1654_v9   ;;  %1679 = vpow2.f32 %v1396_v8  ;;  %v683_v8 = vld [vmem:[%s1815_s18 + $0x50] sm:$0xff] }
  0x9c   : > { %v1662_v15 = vpop.eup %1661  ;;  %1681 = vrcp.f32 %v519_v10 }
  0x9d   : > { %v1664_v16 = vpop.eup %1663  ;;  %1027 = vperm.xlu0 %1409, %v1656_v11   ;;  %1683 = vrcp.f32 %v522_v13  ;;  %v686_v13 = vld [vmem:[%s1815_s18 + $0x68] sm:$0xff] }
  0x9e   : > { %v1666_v17 = vpop.eup %1665 }
  0x9f   : > { %v1668_v18 = vpop.eup %1667  ;;  %1042 = vperm.xlu1 %1410, %v1658_v12  }
  0xa0   : > { %v1670_v19 = vpop.eup %1669  ;;  %v521_v20 = vadd.f32 1.0, %v1668_v18  ;;  %v688_v18 = vld [vmem:[%s1815_s18 + $0x78] sm:$0xff] }
  0xa1   : > { %v1672_v21 = vpop.eup %1671  ;;  %1037 = vperm.xlu0 %1409, %v1660_v14   ;;  %v524_v22 = vadd.f32 1.0, %v1670_v19 }
  0xa2   : > { %v1674_v23 = vpop.eup %1673  ;;  %1685 = vrcp.f32 %v521_v20  ;;  %v523_v24 = vadd.f32 1.0, %v1672_v21  ;;  %v687_v21 = vld [vmem:[%s1815_s18 + $0x70] sm:$0xff] }
  0xa3   : > { %v1676_v25 = vpop.eup %1675  ;;  %1052 = vperm.xlu1 %1410, %v1662_v15   ;;  %1687 = vrcp.f32 %v524_v22  ;;  %v526_v26 = vadd.f32 1.0, %v1674_v23  ;;  %v685_v15 = vld [vmem:[%s1815_s18 + $0x60] sm:$0xff] }
  0xa4   : > { %v1678_v27 = vpop.eup %1677  ;;  %1689 = vrcp.f32 %v523_v24  ;;  %v525_v28 = vadd.f32 1.0, %v1676_v25  ;;  %v690_v24 = vld [vmem:[%s1815_s18 + $0x88] sm:$0xff] }
  0xa5   : > { %v1680_v29 = vpop.eup %1679  ;;  %1047 = vperm.xlu0 %1409, %v1664_v16   ;;  %1691 = vrcp.f32 %v526_v26  ;;  %v528_v31 = vadd.f32 1.0, %v1678_v27  ;;  %v689_v27 = vld [vmem:[%s1815_s18 + $0x80] sm:$0xff] }
  0xa6   : > { %v1682_v30 = vpop.eup %1681  ;;  %1693 = vrcp.f32 %v525_v28  ;;  %v527_v34 = vadd.f32 1.0, %v1680_v29 }
  0xa7   : > { %1062 = vperm.xlu1 %1410, %v1666_v17   ;;  %v1684_v32 = vpop.eup %1683  ;;  %1695 = vrcp.f32 %v528_v31 }
  0xa8   : > { %1697 = vrcp.f32 %v527_v34 }
  0xa9   : > { %1057 = vperm.xlu0 %1409, %v1682_v30   ;;  %v692_v30 = vld [vmem:[%s1815_s18 + $0x98] sm:$0xff] }
  0xaa   : > { %v758_v36 = vpop.permute.xlu1 %757 }
  0xab   : > { %v1107_v37 = vmul.f32 %v758_v36, %v675_v33  ;;  %v748_v38 = vpop.permute.xlu0 %747  ;;  %1072 = vperm.xlu1 %1410, %v1684_v32   ;;  %v691_v33 = vld [vmem:[%s1815_s18 + $0x90] sm:$0xff]  ;;  %v694_v36 = vld [vmem:[%s1815_s18 + $0xa8] sm:$0xff] }
  0xac   : > { %v1686_v39 = vpop.eup %1685  ;;  %v1105_v40 = vmul.f32 %v748_v38, %v673_v35 }
  0xad   : > { %v1688_v42 = vpop.eup %1687  ;;  %1180 = vst.msk [vmem:[%s1823_s21 + $0x10] sm:$0xff] %vm1177_vm0, %v1107_v37  ;;  %1067 = vperm.xlu0 %1409, %v1686_v39   ;;  %v693_v39 = vld [vmem:[%s1815_s18 + $0xa0] sm:$0xff] }
  0xae   : > { %v1690_v44 = vpop.eup %1689  ;;  %1178 = vst.msk [vmem:[%s1823_s21] sm:$0xff] %vm1177_vm0, %v1105_v40  ;;  %v763_v45 = vpop.permute.xlu1 %762 }
  0xaf   : > { %v1108_v46 = vmul.f32 %v763_v45, %v676_v41  ;;  %v753_v47 = vpop.permute.xlu0 %752  ;;  %1082 = vperm.xlu1 %1410, %v1688_v42   ;;  %v1692_v48 = vpop.eup %1691  ;;  %v696_v42 = vld [vmem:[%s1815_s18 + $0xb8] sm:$0xff]  ;;  %v695_v45 = vld [vmem:[%s1815_s18 + $0xb0] sm:$0xff] }
  0xb0   : > { %v1106_v49 = vmul.f32 %v753_v47, %v674_v43  ;;  %v1694_v52 = vpop.eup %1693 }
  0xb1   : > { %1181 = vst.msk [vmem:[%s1823_s21 + $0x18] sm:$0xff] %vm1177_vm0, %v1108_v46  ;;  %1077 = vperm.xlu0 %1409, %v1690_v44   ;;  %v1696_v56 = vpop.eup %1695 }
  0xb2   : > { %1179 = vst.msk [vmem:[%s1823_s21 + $0x8] sm:$0xff] %vm1177_vm0, %v1106_v49  ;;  %v773_v53 = vpop.permute.xlu1 %772  ;;  %v1698_v60 = vpop.eup %1697 }
  0xb3   : > { %v1110_v54 = vmul.f32 %v773_v53, %v678_v50  ;;  %v768_v55 = vpop.permute.xlu0 %767  ;;  %1092 = vperm.xlu1 %1410, %v1692_v48   ;;  %v698_v48 = vld [vmem:[%s1815_s18 + $0xc8] sm:$0xff] }
  0xb4   : > { %v1109_v57 = vmul.f32 %v768_v55, %v677_v51  ;;  %v697_v51 = vld [vmem:[%s1815_s18 + $0xc0] sm:$0xff] }
  0xb5   : > { %1183 = vst.msk [vmem:[%s1823_s21 + $0x28] sm:$0xff] %vm1177_vm0, %v1110_v54  ;;  %1087 = vperm.xlu0 %1409, %v1694_v52   ;;  %v700_v54 = vld [vmem:[%s1815_s18 + $0xd8] sm:$0xff] }
  0xb6   : > { %1182 = vst.msk [vmem:[%s1823_s21 + $0x20] sm:$0xff] %vm1177_vm0, %v1109_v57  ;;  %v783_v61 = vpop.permute.xlu1 %782  ;;  %v699_v57 = vld [vmem:[%s1815_s18 + $0xd0] sm:$0xff] }
  0xb7   : > { %v1112_v62 = vmul.f32 %v783_v61, %v680_v58  ;;  %v778_v63 = vpop.permute.xlu0 %777  ;;  %1102 = vperm.xlu1 %1410, %v1696_v56  }
  0xb8   : > { %v1111_v0 = vmul.f32 %v778_v63, %v679_v59  ;;  %v701_v63 = vld [vmem:[%s1815_s18 + $0xe0] sm:$0xff] }
  0xb9   : > { %1185 = vst.msk [vmem:[%s1823_s21 + $0x38] sm:$0xff] %vm1177_vm0, %v1112_v62  ;;  %1097 = vperm.xlu0 %1409, %v1698_v60   ;;  %v702_v60 = vld [vmem:[%s1815_s18 + $0xe8] sm:$0xff] }
  0xba   : > { %1184 = vst.msk [vmem:[%s1823_s21 + $0x30] sm:$0xff] %vm1177_vm0, %v1111_v0  ;;  %v793_v3 = vpop.permute.xlu1 %792 }
  0xbb   : > { %v1114_v4 = vmul.f32 %v793_v3, %v682_v1  ;;  %v788_v5 = vpop.permute.xlu0 %787 }
  0xbc   : > { %v1113_v6 = vmul.f32 %v788_v5, %v681_v2  ;;  %v704_v2 = vld [vmem:[%s1815_s18 + $0xf8] sm:$0xff]  ;;  %v703_v5 = vld [vmem:[%s1815_s18 + $0xf0] sm:$0xff] }
  0xbd   : > { %1187 = vst.msk [vmem:[%s1823_s21 + $0x48] sm:$0xff] %vm1177_vm0, %v1114_v4 }
  0xbe   : > { %1186 = vst.msk [vmem:[%s1823_s21 + $0x40] sm:$0xff] %vm1177_vm0, %v1113_v6  ;;  %v803_v9 = vpop.permute.xlu1 %802 }
  0xbf   : > { %v1116_v10 = vmul.f32 %v803_v9, %v684_v7  ;;  %v798_v11 = vpop.permute.xlu0 %797 }
  0xc0   : > { %v1115_v12 = vmul.f32 %v798_v11, %v683_v8  ;;  %v706_v8 = vld [vmem:[%s1815_s18 + $0x108] sm:$0xff]  ;;  %v705_v11 = vld [vmem:[%s1815_s18 + $0x100] sm:$0xff] }
  0xc1   : > { %1189 = vst.msk [vmem:[%s1823_s21 + $0x58] sm:$0xff] %vm1177_vm0, %v1116_v10 }
  0xc2   : > { %1188 = vst.msk [vmem:[%s1823_s21 + $0x50] sm:$0xff] %vm1177_vm0, %v1115_v12  ;;  %v813_v14 = vpop.permute.xlu1 %812 }
  0xc3   : > { %v1118_v16 = vmul.f32 %v813_v14, %v686_v13  ;;  %v708_v14 = vld [vmem:[%s1815_s18 + $0x118] sm:$0xff] }
  0xc4   : > { %v808_v17 = vpop.permute.xlu0 %807 }
  0xc5   : > { %1191 = vst.msk [vmem:[%s1823_s21 + $0x68] sm:$0xff] %vm1177_vm0, %v1118_v16  ;;  %v1117_v19 = vmul.f32 %v808_v17, %v685_v15  ;;  %v707_v17 = vld [vmem:[%s1815_s18 + $0x110] sm:$0xff] }
  0xc6   : > { %v823_v20 = vpop.permute.xlu1 %822 }
  0xc7   : > { %1190 = vst.msk [vmem:[%s1823_s21 + $0x60] sm:$0xff] %vm1177_vm0, %v1117_v19  ;;  %v1120_v22 = vmul.f32 %v823_v20, %v688_v18  ;;  %v710_v20 = vld [vmem:[%s1815_s18 + $0x128] sm:$0xff] }
  0xc8   : > { %v818_v23 = vpop.permute.xlu0 %817 }
  0xc9   : > { %1193 = vst.msk [vmem:[%s1823_s21 + $0x78] sm:$0xff] %vm1177_vm0, %v1120_v22  ;;  %v1119_v25 = vmul.f32 %v818_v23, %v687_v21  ;;  %v709_v23 = vld [vmem:[%s1815_s18 + $0x120] sm:$0xff] }
  0xca   : > { %v833_v26 = vpop.permute.xlu1 %832 }
  0xcb   : > { %1192 = vst.msk [vmem:[%s1823_s21 + $0x70] sm:$0xff] %vm1177_vm0, %v1119_v25  ;;  %v1122_v28 = vmul.f32 %v833_v26, %v690_v24  ;;  %v712_v26 = vld [vmem:[%s1815_s18 + $0x138] sm:$0xff] }
  0xcc   : > { %v828_v29 = vpop.permute.xlu0 %827 }
  0xcd   : > { %1195 = vst.msk [vmem:[%s1823_s21 + $0x88] sm:$0xff] %vm1177_vm0, %v1122_v28  ;;  %v1121_v31 = vmul.f32 %v828_v29, %v689_v27  ;;  %v711_v29 = vld [vmem:[%s1815_s18 + $0x130] sm:$0xff] }
  0xce   : > { %v843_v32 = vpop.permute.xlu1 %842 }
  0xcf   : > { %1194 = vst.msk [vmem:[%s1823_s21 + $0x80] sm:$0xff] %vm1177_vm0, %v1121_v31  ;;  %v1124_v34 = vmul.f32 %v843_v32, %v692_v30  ;;  %v714_v32 = vld [vmem:[%s1815_s18 + $0x148] sm:$0xff] }
  0xd0   : > { %v838_v35 = vpop.permute.xlu0 %837 }
  0xd1   : > { %1197 = vst.msk [vmem:[%s1823_s21 + $0x98] sm:$0xff] %vm1177_vm0, %v1124_v34  ;;  %v1123_v37 = vmul.f32 %v838_v35, %v691_v33  ;;  %v713_v35 = vld [vmem:[%s1815_s18 + $0x140] sm:$0xff] }
  0xd2   : > { %v853_v38 = vpop.permute.xlu1 %852 }
  0xd3   : > { %1196 = vst.msk [vmem:[%s1823_s21 + $0x90] sm:$0xff] %vm1177_vm0, %v1123_v37  ;;  %v1126_v40 = vmul.f32 %v853_v38, %v694_v36  ;;  %v716_v38 = vld [vmem:[%s1815_s18 + $0x158] sm:$0xff] }
  0xd4   : > { %v848_v41 = vpop.permute.xlu0 %847 }
  0xd5   : > { %1199 = vst.msk [vmem:[%s1823_s21 + $0xa8] sm:$0xff] %vm1177_vm0, %v1126_v40  ;;  %v1125_v43 = vmul.f32 %v848_v41, %v693_v39  ;;  %v715_v41 = vld [vmem:[%s1815_s18 + $0x150] sm:$0xff] }
  0xd6   : > { %v863_v44 = vpop.permute.xlu1 %862 }
  0xd7   : > { %1198 = vst.msk [vmem:[%s1823_s21 + $0xa0] sm:$0xff] %vm1177_vm0, %v1125_v43  ;;  %v1128_v46 = vmul.f32 %v863_v44, %v696_v42  ;;  %v718_v44 = vld [vmem:[%s1815_s18 + $0x168] sm:$0xff] }
  0xd8   : > { %v858_v47 = vpop.permute.xlu0 %857 }
  0xd9   : > { %1201 = vst.msk [vmem:[%s1823_s21 + $0xb8] sm:$0xff] %vm1177_vm0, %v1128_v46  ;;  %v1127_v49 = vmul.f32 %v858_v47, %v695_v45  ;;  %v717_v47 = vld [vmem:[%s1815_s18 + $0x160] sm:$0xff] }
  0xda   : > { %v873_v50 = vpop.permute.xlu1 %872 }
  0xdb   : > { %1200 = vst.msk [vmem:[%s1823_s21 + $0xb0] sm:$0xff] %vm1177_vm0, %v1127_v49  ;;  %v1130_v52 = vmul.f32 %v873_v50, %v698_v48  ;;  %v720_v50 = vld [vmem:[%s1815_s18 + $0x178] sm:$0xff] }
  0xdc   : > { %v868_v53 = vpop.permute.xlu0 %867 }
  0xdd   : > { %1203 = vst.msk [vmem:[%s1823_s21 + $0xc8] sm:$0xff] %vm1177_vm0, %v1130_v52  ;;  %v1129_v55 = vmul.f32 %v868_v53, %v697_v51  ;;  %v719_v53 = vld [vmem:[%s1815_s18 + $0x170] sm:$0xff] }
  0xde   : > { %v883_v56 = vpop.permute.xlu1 %882 }
  0xdf   : > { %1202 = vst.msk [vmem:[%s1823_s21 + $0xc0] sm:$0xff] %vm1177_vm0, %v1129_v55  ;;  %v1132_v58 = vmul.f32 %v883_v56, %v700_v54  ;;  %v722_v56 = vld [vmem:[%s1815_s18 + $0x188] sm:$0xff] }
  0xe0   : > { %v878_v59 = vpop.permute.xlu0 %877 }
  0xe1   : > { %1205 = vst.msk [vmem:[%s1823_s21 + $0xd8] sm:$0xff] %vm1177_vm0, %v1132_v58  ;;  %v1131_v61 = vmul.f32 %v878_v59, %v699_v57  ;;  %v721_v59 = vld [vmem:[%s1815_s18 + $0x180] sm:$0xff] }
  0xe2   : > { %v893_v62 = vpop.permute.xlu1 %892 }
  0xe3   : > { %1204 = vst.msk [vmem:[%s1823_s21 + $0xd0] sm:$0xff] %vm1177_vm0, %v1131_v61  ;;  %v1134_v0 = vmul.f32 %v893_v62, %v702_v60  ;;  %v724_v62 = vld [vmem:[%s1815_s18 + $0x198] sm:$0xff] }
  0xe4   : > { %v888_v1 = vpop.permute.xlu0 %887 }
  0xe5   : > { %1207 = vst.msk [vmem:[%s1823_s21 + $0xe8] sm:$0xff] %vm1177_vm0, %v1134_v0  ;;  %v1133_v3 = vmul.f32 %v888_v1, %v701_v63  ;;  %v723_v1 = vld [vmem:[%s1815_s18 + $0x190] sm:$0xff] }
  0xe6   : > { %v903_v4 = vpop.permute.xlu1 %902 }
  0xe7   : > { %1206 = vst.msk [vmem:[%s1823_s21 + $0xe0] sm:$0xff] %vm1177_vm0, %v1133_v3  ;;  %v1136_v6 = vmul.f32 %v903_v4, %v704_v2  ;;  %v726_v4 = vld [vmem:[%s1815_s18 + $0x1a8] sm:$0xff] }
  0xe8   : > { %v898_v7 = vpop.permute.xlu0 %897 }
  0xe9   : > { %1209 = vst.msk [vmem:[%s1823_s21 + $0xf8] sm:$0xff] %vm1177_vm0, %v1136_v6  ;;  %v1135_v9 = vmul.f32 %v898_v7, %v703_v5  ;;  %v725_v7 = vld [vmem:[%s1815_s18 + $0x1a0] sm:$0xff] }
  0xea   : > { %v913_v10 = vpop.permute.xlu1 %912 }
  0xeb   : > { %1208 = vst.msk [vmem:[%s1823_s21 + $0xf0] sm:$0xff] %vm1177_vm0, %v1135_v9  ;;  %v1138_v12 = vmul.f32 %v913_v10, %v706_v8  ;;  %v728_v10 = vld [vmem:[%s1815_s18 + $0x1b8] sm:$0xff] }
  0xec   : > { %v908_v13 = vpop.permute.xlu0 %907 }
  0xed   : > { %1211 = vst.msk [vmem:[%s1823_s21 + $0x108] sm:$0xff] %vm1177_vm0, %v1138_v12  ;;  %v1137_v15 = vmul.f32 %v908_v13, %v705_v11  ;;  %v727_v13 = vld [vmem:[%s1815_s18 + $0x1b0] sm:$0xff] }
  0xee   : > { %v923_v16 = vpop.permute.xlu1 %922 }
  0xef   : > { %1210 = vst.msk [vmem:[%s1823_s21 + $0x100] sm:$0xff] %vm1177_vm0, %v1137_v15  ;;  %v1140_v18 = vmul.f32 %v923_v16, %v708_v14  ;;  %v730_v16 = vld [vmem:[%s1815_s18 + $0x1c8] sm:$0xff] }
  0xf0   : > { %v918_v19 = vpop.permute.xlu0 %917 }
  0xf1   : > { %1213 = vst.msk [vmem:[%s1823_s21 + $0x118] sm:$0xff] %vm1177_vm0, %v1140_v18  ;;  %v1139_v21 = vmul.f32 %v918_v19, %v707_v17  ;;  %v729_v19 = vld [vmem:[%s1815_s18 + $0x1c0] sm:$0xff] }
  0xf2   : > { %v933_v22 = vpop.permute.xlu1 %932 }
  0xf3   : > { %1212 = vst.msk [vmem:[%s1823_s21 + $0x110] sm:$0xff] %vm1177_vm0, %v1139_v21  ;;  %v1142_v24 = vmul.f32 %v933_v22, %v710_v20  ;;  %v732_v22 = vld [vmem:[%s1815_s18 + $0x1d8] sm:$0xff] }
  0xf4   : > { %v928_v25 = vpop.permute.xlu0 %927 }
  0xf5   : > { %1215 = vst.msk [vmem:[%s1823_s21 + $0x128] sm:$0xff] %vm1177_vm0, %v1142_v24  ;;  %v1141_v27 = vmul.f32 %v928_v25, %v709_v23  ;;  %v731_v25 = vld [vmem:[%s1815_s18 + $0x1d0] sm:$0xff] }
  0xf6   : > { %v943_v28 = vpop.permute.xlu1 %942 }
  0xf7   : > { %1214 = vst.msk [vmem:[%s1823_s21 + $0x120] sm:$0xff] %vm1177_vm0, %v1141_v27  ;;  %v1144_v30 = vmul.f32 %v943_v28, %v712_v26  ;;  %v734_v28 = vld [vmem:[%s1815_s18 + $0x1e8] sm:$0xff] }
  0xf8   : > { %v938_v31 = vpop.permute.xlu0 %937 }
  0xf9   : > { %1217 = vst.msk [vmem:[%s1823_s21 + $0x138] sm:$0xff] %vm1177_vm0, %v1144_v30  ;;  %v1143_v33 = vmul.f32 %v938_v31, %v711_v29  ;;  %v733_v31 = vld [vmem:[%s1815_s18 + $0x1e0] sm:$0xff] }
  0xfa   : > { %v953_v34 = vpop.permute.xlu1 %952 }
  0xfb   : > { %1216 = vst.msk [vmem:[%s1823_s21 + $0x130] sm:$0xff] %vm1177_vm0, %v1143_v33  ;;  %v1146_v36 = vmul.f32 %v953_v34, %v714_v32  ;;  %v736_v34 = vld [vmem:[%s1815_s18 + $0x1f8] sm:$0xff] }
  0xfc   : > { %v948_v37 = vpop.permute.xlu0 %947 }
  0xfd   : > { %1219 = vst.msk [vmem:[%s1823_s21 + $0x148] sm:$0xff] %vm1177_vm0, %v1146_v36  ;;  %v1145_v39 = vmul.f32 %v948_v37, %v713_v35  ;;  %v735_v37 = vld [vmem:[%s1815_s18 + $0x1f0] sm:$0xff] }
  0xfe   : > { %v963_v40 = vpop.permute.xlu1 %962 }
  0xff   : > { %1218 = vst.msk [vmem:[%s1823_s21 + $0x140] sm:$0xff] %vm1177_vm0, %v1145_v39  ;;  %v1148_v42 = vmul.f32 %v963_v40, %v716_v38  ;;  %v738_v40 = vld [vmem:[%s1815_s18 + $0x208] sm:$0xff] }
 0x100   : > { %v958_v43 = vpop.permute.xlu0 %957 }
 0x101   : > { %1221 = vst.msk [vmem:[%s1823_s21 + $0x158] sm:$0xff] %vm1177_vm0, %v1148_v42  ;;  %v1147_v45 = vmul.f32 %v958_v43, %v715_v41  ;;  %v737_v43 = vld [vmem:[%s1815_s18 + $0x200] sm:$0xff] }
 0x102   : > { %v973_v46 = vpop.permute.xlu1 %972 }
 0x103   : > { %1220 = vst.msk [vmem:[%s1823_s21 + $0x150] sm:$0xff] %vm1177_vm0, %v1147_v45  ;;  %v1150_v48 = vmul.f32 %v973_v46, %v718_v44  ;;  %v740_v46 = vld [vmem:[%s1815_s18 + $0x218] sm:$0xff] }
 0x104   : > { %v968_v49 = vpop.permute.xlu0 %967 }
 0x105   : > { %1223 = vst.msk [vmem:[%s1823_s21 + $0x168] sm:$0xff] %vm1177_vm0, %v1150_v48  ;;  %v1149_v51 = vmul.f32 %v968_v49, %v717_v47  ;;  %v739_v49 = vld [vmem:[%s1815_s18 + $0x210] sm:$0xff] }
 0x106   : > { %v983_v52 = vpop.permute.xlu1 %982 }
 0x107   : > { %1222 = vst.msk [vmem:[%s1823_s21 + $0x160] sm:$0xff] %vm1177_vm0, %v1149_v51  ;;  %v1152_v54 = vmul.f32 %v983_v52, %v720_v50  ;;  %v742_v52 = vld [vmem:[%s1815_s18 + $0x228] sm:$0xff] }
 0x108   : > { %v978_v55 = vpop.permute.xlu0 %977 }
 0x109   : > { %1225 = vst.msk [vmem:[%s1823_s21 + $0x178] sm:$0xff] %vm1177_vm0, %v1152_v54  ;;  %v1151_v57 = vmul.f32 %v978_v55, %v719_v53  ;;  %v741_v55 = vld [vmem:[%s1815_s18 + $0x220] sm:$0xff] }
 0x10a   : > { %v993_v58 = vpop.permute.xlu1 %992 }
 0x10b   : > { %1224 = vst.msk [vmem:[%s1823_s21 + $0x170] sm:$0xff] %vm1177_vm0, %v1151_v57  ;;  %v1154_v60 = vmul.f32 %v993_v58, %v722_v56  ;;  %v744_v58 = vld [vmem:[%s1815_s18 + $0x238] sm:$0xff] }
 0x10c   : > { %v988_v61 = vpop.permute.xlu0 %987 }
 0x10d   : > { %1227 = vst.msk [vmem:[%s1823_s21 + $0x188] sm:$0xff] %vm1177_vm0, %v1154_v60  ;;  %v1153_v63 = vmul.f32 %v988_v61, %v721_v59  ;;  %v743_v61 = vld [vmem:[%s1815_s18 + $0x230] sm:$0xff] }
 0x10e   : > { %v1003_v0 = vpop.permute.xlu1 %1002 }
 0x10f   : > { %1226 = vst.msk [vmem:[%s1823_s21 + $0x180] sm:$0xff] %vm1177_vm0, %v1153_v63  ;;  %v1156_v2 = vmul.f32 %v1003_v0, %v724_v62 }
 0x110   : > { %v998_v3 = vpop.permute.xlu0 %997 }
 0x111   : > { %1229 = vst.msk [vmem:[%s1823_s21 + $0x198] sm:$0xff] %vm1177_vm0, %v1156_v2  ;;  %v1155_v5 = vmul.f32 %v998_v3, %v723_v1 }
 0x112   : > { %v1013_v6 = vpop.permute.xlu1 %1012 }
 0x113   : > { %1228 = vst.msk [vmem:[%s1823_s21 + $0x190] sm:$0xff] %vm1177_vm0, %v1155_v5  ;;  %v1158_v8 = vmul.f32 %v1013_v6, %v726_v4 }
 0x114   : > { %v1008_v9 = vpop.permute.xlu0 %1007 }
 0x115   : > { %1231 = vst.msk [vmem:[%s1823_s21 + $0x1a8] sm:$0xff] %vm1177_vm0, %v1158_v8  ;;  %v1157_v11 = vmul.f32 %v1008_v9, %v725_v7 }
 0x116   : > { %v1023_v12 = vpop.permute.xlu1 %1022 }
 0x117   : > { %1230 = vst.msk [vmem:[%s1823_s21 + $0x1a0] sm:$0xff] %vm1177_vm0, %v1157_v11  ;;  %v1160_v14 = vmul.f32 %v1023_v12, %v728_v10 }
 0x118   : > { %v1018_v15 = vpop.permute.xlu0 %1017 }
 0x119   : > { %1233 = vst.msk [vmem:[%s1823_s21 + $0x1b8] sm:$0xff] %vm1177_vm0, %v1160_v14  ;;  %v1159_v17 = vmul.f32 %v1018_v15, %v727_v13 }
 0x11a   : > { %v1033_v18 = vpop.permute.xlu1 %1032 }
 0x11b   : > { %1232 = vst.msk [vmem:[%s1823_s21 + $0x1b0] sm:$0xff] %vm1177_vm0, %v1159_v17  ;;  %v1162_v20 = vmul.f32 %v1033_v18, %v730_v16 }
 0x11c   : > { %v1028_v21 = vpop.permute.xlu0 %1027 }
 0x11d   : > { %1235 = vst.msk [vmem:[%s1823_s21 + $0x1c8] sm:$0xff] %vm1177_vm0, %v1162_v20  ;;  %v1161_v23 = vmul.f32 %v1028_v21, %v729_v19 }
 0x11e   : > { %v1043_v24 = vpop.permute.xlu1 %1042 }
 0x11f   : > { %1234 = vst.msk [vmem:[%s1823_s21 + $0x1c0] sm:$0xff] %vm1177_vm0, %v1161_v23  ;;  %v1164_v26 = vmul.f32 %v1043_v24, %v732_v22 }
 0x120   : > { %v1038_v27 = vpop.permute.xlu0 %1037 }
 0x121   : > { %1237 = vst.msk [vmem:[%s1823_s21 + $0x1d8] sm:$0xff] %vm1177_vm0, %v1164_v26  ;;  %v1163_v29 = vmul.f32 %v1038_v27, %v731_v25 }
 0x122   : > { %v1053_v30 = vpop.permute.xlu1 %1052 }
 0x123   : > { %1236 = vst.msk [vmem:[%s1823_s21 + $0x1d0] sm:$0xff] %vm1177_vm0, %v1163_v29  ;;  %v1166_v32 = vmul.f32 %v1053_v30, %v734_v28 }
 0x124   : > { %v1048_v33 = vpop.permute.xlu0 %1047 }
 0x125   : > { %1239 = vst.msk [vmem:[%s1823_s21 + $0x1e8] sm:$0xff] %vm1177_vm0, %v1166_v32  ;;  %v1165_v35 = vmul.f32 %v1048_v33, %v733_v31 }
 0x126   : > { %v1063_v36 = vpop.permute.xlu1 %1062 }
 0x127   : > { %1238 = vst.msk [vmem:[%s1823_s21 + $0x1e0] sm:$0xff] %vm1177_vm0, %v1165_v35  ;;  %v1168_v38 = vmul.f32 %v1063_v36, %v736_v34 }
 0x128   : > { %v1058_v39 = vpop.permute.xlu0 %1057 }
 0x129   : > { %1241 = vst.msk [vmem:[%s1823_s21 + $0x1f8] sm:$0xff] %vm1177_vm0, %v1168_v38  ;;  %v1167_v41 = vmul.f32 %v1058_v39, %v735_v37 }
 0x12a   : > { %v1073_v42 = vpop.permute.xlu1 %1072 }
 0x12b   : > { %1240 = vst.msk [vmem:[%s1823_s21 + $0x1f0] sm:$0xff] %vm1177_vm0, %v1167_v41  ;;  %v1170_v44 = vmul.f32 %v1073_v42, %v738_v40 }
 0x12c   : > { %v1068_v45 = vpop.permute.xlu0 %1067 }
 0x12d   : > { %1243 = vst.msk [vmem:[%s1823_s21 + $0x208] sm:$0xff] %vm1177_vm0, %v1170_v44  ;;  %v1169_v47 = vmul.f32 %v1068_v45, %v737_v43 }
 0x12e   : > { %v1083_v48 = vpop.permute.xlu1 %1082 }
 0x12f   : > { %1242 = vst.msk [vmem:[%s1823_s21 + $0x200] sm:$0xff] %vm1177_vm0, %v1169_v47  ;;  %v1172_v50 = vmul.f32 %v1083_v48, %v740_v46 }
 0x130   : > { %v1078_v51 = vpop.permute.xlu0 %1077 }
 0x131   : > { %1245 = vst.msk [vmem:[%s1823_s21 + $0x218] sm:$0xff] %vm1177_vm0, %v1172_v50  ;;  %v1171_v53 = vmul.f32 %v1078_v51, %v739_v49 }
 0x132   : > { %v1093_v54 = vpop.permute.xlu1 %1092 }
 0x133   : > { %1244 = vst.msk [vmem:[%s1823_s21 + $0x210] sm:$0xff] %vm1177_vm0, %v1171_v53  ;;  %v1174_v56 = vmul.f32 %v1093_v54, %v742_v52 }
 0x134   : > { %v1088_v57 = vpop.permute.xlu0 %1087 }
 0x135   : > { %1247 = vst.msk [vmem:[%s1823_s21 + $0x228] sm:$0xff] %vm1177_vm0, %v1174_v56  ;;  %v1173_v59 = vmul.f32 %v1088_v57, %v741_v55 }
 0x136   : > { %v1103_v60 = vpop.permute.xlu1 %1102 }
 0x137   : > { %1246 = vst.msk [vmem:[%s1823_s21 + $0x220] sm:$0xff] %vm1177_vm0, %v1173_v59  ;;  %v1176_v62 = vmul.f32 %v1103_v60, %v744_v58 }
 0x138   : > { %v1098_v63 = vpop.permute.xlu0 %1097 }
 0x139   : > { %1249 = vst.msk [vmem:[%s1823_s21 + $0x238] sm:$0xff] %vm1177_vm0, %v1176_v62  ;;  %v1175_v0 = vmul.f32 %v1098_v63, %v743_v61 }
 0x13b   : > { %1248 = vst.msk [vmem:[%s1823_s21 + $0x230] sm:$0xff] %vm1177_vm0, %v1175_v0 }
 0x13c PF: > { %s12_s9 = sadd.s32 1, %s1705_s9  }
 0x13d   : > { %p9_p4 = scmp.ge.s32.totalorder %s12_s9, 6  }
 0x13f   :  { %11 = sbr.rel (!%p9_p4) target bundleno = 1 (0x1), region = 61 }

</bundles_post_ra>
